<compile_context>
chip_gen: v7x
topology: tpu7x:2x2x1
jax: 0.10.0
libtpu: 0.0.40
codegen_flags: <defaults>
</compile_context>

<pallas_src>
import functools

import jax
import jax.numpy as jnp
from jax.experimental import pallas as pl
from jax.experimental.pallas import tpu as pltpu


def _round_up(x: int, m: int) -> int:
    return ((x + m - 1) // m) * m


def _cdiv(a: int, b: int) -> int:
    return -(-a // b)


def _vmem_capacity_bytes() -> int:
    # Per-TensorCore VMEM: 128 MiB on v5e/v6e, 64 MiB on v7x.
    try:
        return int(pltpu.get_tpu_info().vmem_capacity_bytes)
    except Exception:
        return 64 * 1024 * 1024  # conservative fallback (v7x per-TC)


def mlp_classifier_kernel(x_ref, w1_ref, b1_ref, w2_ref, b2_ref, out_ref, acc_ref):
    # Grid = (batch tiles, K slabs). The output block index depends only on the
    # batch tile, so it stays VMEM-resident across the K axis ("arbitrary").
    k = pl.program_id(1)

    @pl.when(k == 0)
    def _init():
        acc_ref[...] = jnp.zeros_like(acc_ref)

    # Layer 1 partial matmul on the current K slab. x streams in its HBM dtype
    # and is cast to the MXU dtype in-register (VPU, hidden under MXU/DMA) --
    # avoids a separate wrapper-side HBM convert pass over x.
    x = x_ref[...].astype(w1_ref.dtype)
    acc_ref[...] += jnp.dot(x, w1_ref[...], preferred_element_type=jnp.float32)

    # TODO(synk): F.dropout is training-mode only; with_dropout=False / eval mode
    # makes it an identity in the reference forward, so it is omitted here.

    @pl.when(k == pl.num_programs(1) - 1)
    def _finalize():
        # Bias + ReLU in f32 (VPU), layer 2 on the MXU (f32 accumulate), then a
        # numerically stable log_softmax over the padded class axis. Padded
        # class columns carry bias -1e30 so exp(shifted) ~ 0 there and the LSE
        # over the real classes is exact; padded hidden columns are exact zeros.
        h1 = jnp.maximum(acc_ref[...] + b1_ref[...], 0.0)
        logits = (
            jnp.dot(h1.astype(w2_ref.dtype), w2_ref[...],
                    preferred_element_type=jnp.float32)
            + b2_ref[...]
        )
        m = jnp.max(logits, axis=1, keepdims=True)
        shifted = logits - m
        lse = jnp.log(jnp.sum(jnp.exp(shifted), axis=1, keepdims=True))
        out_ref[...] = (shifted - lse).astype(out_ref.dtype)


@functools.partial(jax.jit, static_argnames=("compute_dtype", "block_b", "block_k"))
def mlp_classifier_forward(x, w1, b1, w2, b2, *, compute_dtype=jnp.float32,
                           block_b=1024, block_k=None):
    """x: (B, D_in); w1: (D_in, H); b1: (H,); w2: (H, C); b2: (C,). Returns (B, C) f32."""
    B, D_in = x.shape
    H = w1.shape[1]
    C = w2.shape[1]
    cb = jnp.dtype(compute_dtype).itemsize
    xb = jnp.dtype(x.dtype).itemsize

    vmem_cap = _vmem_capacity_bytes()
    budget = int(vmem_cap * 0.80)           # leave headroom for Mosaic internals

    # --- lane-dense padding of hidden / class dims (one-time weight prep) ---
    # v6e/v7x MXUs are 256 wide -> round larger hidden dims to 256 so matmul-1
    # fills the array; small H stays at 128 (full width on v5e; tiny matmuls are
    # mem-bound anyway).
    h_mult = 256 if H > 128 else 128
    H_pad = _round_up(H, h_mult)
    C_pad = _round_up(C, 128)
    NEG = jnp.float32(-1e30)  # padded-class bias: drives padded logits out of the LSE

    # --- K (D_in) tiling: keep W1 fully resident when it fits, else stream slabs ---
    w2_bytes = H_pad * C_pad * cb + (H_pad + C_pad) * 4
    if block_k is not None:
        TK = _round_up(min(block_k, D_in), 128)
    elif D_in * H_pad * cb + w2_bytes <= budget // 2:
        TK = D_in                              # whole reduction dim resident, 1 K step
    else:
        TK = 512                               # stream W1 in (512, H_pad) slabs
    if TK >= D_in:
        TK = D_in
        Din_pad = D_in
    else:
        Din_pad = _round_up(D_in, TK)
    n_k = Din_pad // TK

    w1_p = w1
    x_in = x
    if Din_pad != D_in:
        # Zero-padding the contraction dim is an exact no-op; only needed when W1
        # must be K-tiled (large D_in), where this one-time x copy is small
        # relative to the streamed weight traffic.
        x_in = jnp.pad(x_in, ((0, 0), (0, Din_pad - D_in)))
        w1_p = jnp.pad(w1_p, ((0, Din_pad - D_in), (0, 0)))
    w1_p = jnp.pad(w1_p, ((0, 0), (0, H_pad - H))).astype(compute_dtype)
    b1_p = jnp.pad(b1, (0, H_pad - H)).astype(jnp.float32).reshape(1, H_pad)
    w2_p = jnp.pad(w2, ((0, H_pad - H), (0, C_pad - C))).astype(compute_dtype)
    b2_p = jnp.pad(
        b2.astype(jnp.float32), (0, C_pad - C), constant_values=NEG
    ).reshape(1, C_pad)

    # --- batch tiling: ragged last block (no wrapper batch-pad copy); at least 2
    # batch tiles when B allows so "parallel" shards across v7x's two TCs ---
    n_b_target = max(2, _cdiv(B, block_b)) if B > 16 else 1
    TB = min(_round_up(_cdiv(B, n_b_target), 8), _round_up(B, 8), _round_up(block_b, 8))
    TB = max(TB, 8)

    # Single-buffered resident weights (constant index -> 2nd pipeline buffer is waste).
    weight_bytes = (TK * H_pad * cb) * (1 if n_k == 1 else 2) + w2_bytes

    def tile_bytes(tb):
        return (
            2 * tb * TK * xb       # x tile (double-buffered)
            + 2 * tb * C_pad * 4   # out tile (double-buffered, f32)
            + tb * H_pad * 4       # f32 accumulator scratch
            + tb * H_pad * cb      # h1 cast temp
            + tb * C_pad * 4       # logits temp
        )

    while TB > 8 and weight_bytes + tile_bytes(TB) > budget:
        TB = _round_up(TB // 2, 8)

    grid = (_cdiv(B, TB), n_k)
    vmem_limit = int(
        min(0.90 * vmem_cap,
            max(32 * 1024 * 1024, 1.5 * (weight_bytes + tile_bytes(TB))))
    )

    if n_k == 1:
        # Constant block index across the whole grid -> single buffer.
        w1_spec = pl.BlockSpec((TK, H_pad), lambda i, k: (0, 0),
                               pipeline_mode=pl.Buffered(1))
    else:
        w1_spec = pl.BlockSpec((TK, H_pad), lambda i, k: (k, 0))

    out = pl.pallas_call(
        mlp_classifier_kernel,
        out_shape=jax.ShapeDtypeStruct((B, C_pad), jnp.float32),
        grid=grid,
        in_specs=[
            pl.BlockSpec((TB, TK), lambda i, k: (i, k)),      # x: streamed per tile
            w1_spec,                                          # W1: resident or K-streamed
            pl.BlockSpec((1, H_pad), lambda i, k: (0, 0),     # b1: resident, 1 buffer
                         pipeline_mode=pl.Buffered(1)),
            pl.BlockSpec((H_pad, C_pad), lambda i, k: (0, 0),  # W2: resident, 1 buffer
                         pipeline_mode=pl.Buffered(1)),
            pl.BlockSpec((1, C_pad), lambda i, k: (0, 0),     # b2: resident, 1 buffer
                         pipeline_mode=pl.Buffered(1)),
        ],
        out_specs=pl.BlockSpec((TB, C_pad), lambda i, k: (i, 0)),
        scratch_shapes=[pltpu.VMEM((TB, H_pad), jnp.float32)],
        compiler_params=pltpu.CompilerParams(
            dimension_semantics=("parallel", "arbitrary"),
            vmem_limit_bytes=vmem_limit,
        ),
    )(x_in, w1_p, b1_p, w2_p, b2_p)

    return out[:, :C]


def init_params(key, input_size, hidden_size, num_class):
    """Deterministic Glorot-style init (mirrors weights_init on nn.Linear shapes)."""
    k1, k2, k3, k4 = jax.random.split(key, 4)
    # PyTorch nn.Linear weight is (out, in); we store transposed (in, out).
    s1 = (2.0 / (input_size + hidden_size)) ** 0.5
    s2 = (2.0 / (hidden_size + num_class)) ** 0.5
    w1 = jax.random.normal(k1, (input_size, hidden_size), jnp.float32) * s1
    b1 = jax.random.normal(k2, (hidden_size,), jnp.float32) * 0.01
    w2 = jax.random.normal(k3, (hidden_size, num_class), jnp.float32) * s2
    b2 = jax.random.normal(k4, (num_class,), jnp.float32) * 0.01
    return w1, b1, w2, b2


def reference_forward(x, w1, b1, w2, b2):
    with jax.default_matmul_precision("highest"):
        h1 = jnp.maximum(x @ w1 + b1, 0.0)
        logits = h1 @ w2 + b2
    return jax.nn.log_softmax(logits, axis=1)


if __name__ == "__main__":
    key = jax.random.PRNGKey(0)
    k_x, k_x2, k_x3, k_x4, k_p, k_p2 = jax.random.split(key, 6)

    batch, input_size, hidden_size, num_class = 8, 16, 32, 8
    x = jax.random.normal(k_x, (batch, input_size), jnp.float32)
    w1, b1, w2, b2 = init_params(k_p, input_size, hidden_size, num_class)

    # f32 path: tight check vs JAX reference.
    out = jax.block_until_ready(mlp_classifier_forward(x, w1, b1, w2, b2))
    ref = reference_forward(x, w1, b1, w2, b2)
    assert out.shape == (batch, num_class)
    assert jnp.allclose(out, ref, atol=2e-5, rtol=2e-5), "f32 mismatch vs JAX reference"

    # Ragged batch (13 rows): single oversized block, masked output writeback.
    x_r = jax.random.normal(k_x2, (13, input_size), jnp.float32)
    out_r = jax.block_until_ready(mlp_classifier_forward(x_r, w1, b1, w2, b2))
    ref_r = reference_forward(x_r, w1, b1, w2, b2)
    assert out_r.shape == (13, num_class)
    assert jnp.allclose(out_r, ref_r, atol=2e-5, rtol=2e-5), "ragged-batch mismatch"

    # Multi-tile batch with a ragged last tile (>= 2 grid steps path).
    x_m = jax.random.normal(k_x3, (40, input_size), jnp.float32)
    out_m = jax.block_until_ready(mlp_classifier_forward(x_m, w1, b1, w2, b2))
    ref_m = reference_forward(x_m, w1, b1, w2, b2)
    assert out_m.shape == (40, num_class)
    assert jnp.allclose(out_m, ref_m, atol=2e-5, rtol=2e-5), "multi-tile mismatch"

    # bf16 MXU path (f32 accumulate + f32 softmax, in-kernel x cast): loose check.
    out_bf = jax.block_until_ready(
        mlp_classifier_forward(x, w1, b1, w2, b2, compute_dtype=jnp.bfloat16)
    )
    assert out_bf.shape == (batch, num_class)
    assert jnp.allclose(out_bf, ref, atol=5e-2, rtol=5e-2), "bf16 mismatch vs reference"

    # K-tiled path: D_in=256 streamed as two 128-wide slabs into the f32 accumulator.
    x_k = jax.random.normal(k_x4, (16, 256), jnp.float32)
    w1k, b1k, w2k, b2k = init_params(k_p2, 256, hidden_size, num_class)
    out_k = jax.block_until_ready(
        mlp_classifier_forward(x_k, w1k, b1k, w2k, b2k, block_k=128)
    )
    ref_k = reference_forward(x_k, w1k, b1k, w2k, b2k)
    assert out_k.shape == (16, num_class)
    assert jnp.allclose(out_k, ref_k, atol=1e-4, rtol=1e-4), "K-tiled mismatch"

    print("KERNEL_OK")
</pallas_src>

<mosaic_0001>
module attributes {stable_mosaic.version = 11 : i64} {
  func.func @mlp_classifier_kernel(%arg0: i32, %arg1: i32, %arg2: memref<8x16xf32, #tpu.memory_space<vmem>>, %arg3: memref<16x128xf32, #tpu.memory_space<vmem>>, %arg4: memref<1x128xf32, #tpu.memory_space<vmem>>, %arg5: memref<128x128xf32, #tpu.memory_space<vmem>>, %arg6: memref<1x128xf32, #tpu.memory_space<vmem>>, %arg7: memref<8x128xf32, #tpu.memory_space<vmem>>, %arg8: memref<8x128xf32, #tpu.memory_space<vmem>>) attributes {dimension_semantics = [#tpu.dimension_semantics<parallel>, #tpu.dimension_semantics<arbitrary>], iteration_bounds = array<i64: 1, 1>, scalar_prefetch = 0 : i64, scratch_operands = 1 : i64, tpu.core_type = #tpu.core_type<tc>, window_params = [{transform_indices = @transform_0, window_bounds = array<i64: 8, 16>}, {pipeline_mode = #tpu.pipeline_mode<synchronous>, transform_indices = @transform_1, window_bounds = array<i64: 16, 128>}, {pipeline_mode = #tpu.pipeline_mode<synchronous>, transform_indices = @transform_2, window_bounds = array<i64: 1, 128>}, {pipeline_mode = #tpu.pipeline_mode<synchronous>, transform_indices = @transform_3, window_bounds = array<i64: 128, 128>}, {pipeline_mode = #tpu.pipeline_mode<synchronous>, transform_indices = @transform_4, window_bounds = array<i64: 1, 128>}, {transform_indices = @transform_5, window_bounds = array<i64: 8, 128>}]} {
    %c0_i32 = arith.constant 0 : i32
    %0 = arith.cmpi eq, %arg1, %c0_i32 : i32
    %1 = arith.extui %0 : i1 to i32
    %c0_i32_0 = arith.constant 0 : i32
    %2 = arith.cmpi ne, %1, %c0_i32_0 : i32
    scf.if %2 {
      %cst_10 = arith.constant 0.000000e+00 : f32
      %12 = vector.broadcast %cst_10 : f32 to vector<8x128xf32>
      %c0_11 = arith.constant 0 : index
      %c0_12 = arith.constant 0 : index
      %13 = vector.load %arg8[%c0_11, %c0_12] : memref<8x128xf32, #tpu.memory_space<vmem>>, vector<8x128xf32>
      tpu.vector_store %arg8[%c0_11, %c0_12], %12 {strides = array<i32>} : memref<8x128xf32, #tpu.memory_space<vmem>>, vector<8x128xf32>,
    } else {
    }
    %c0 = arith.constant 0 : index
    %c0_1 = arith.constant 0 : index
    %3 = vector.load %arg2[%c0, %c0_1] : memref<8x16xf32, #tpu.memory_space<vmem>>, vector<8x16xf32>
    %c0_2 = arith.constant 0 : index
    %c0_3 = arith.constant 0 : index
    %4 = vector.load %arg8[%c0_2, %c0_3] : memref<8x128xf32, #tpu.memory_space<vmem>>, vector<8x128xf32>
    %c0_4 = arith.constant 0 : index
    %c0_5 = arith.constant 0 : index
    %5 = vector.load %arg3[%c0_4, %c0_5] : memref<16x128xf32, #tpu.memory_space<vmem>>, vector<16x128xf32>
    %cst = arith.constant dense<0.000000e+00> : vector<8x128xf32>
    %6 = tpu.matmul %3, %5, %cst {dimension_numbers = #tpu.dot_dimension_numbers<[1], [0], [0], [1], [0, 0, 1, 1], [], []>} : vector<8x16xf32>, vector<16x128xf32>, vector<8x128xf32> -> vector<8x128xf32>
    %7 = arith.addf %4, %6 : vector<8x128xf32>
    %c0_6 = arith.constant 0 : index
    %c0_7 = arith.constant 0 : index
    %8 = vector.load %arg8[%c0_6, %c0_7] : memref<8x128xf32, #tpu.memory_space<vmem>>, vector<8x128xf32>
    tpu.vector_store %arg8[%c0_6, %c0_7], %7 {strides = array<i32>} : memref<8x128xf32, #tpu.memory_space<vmem>>, vector<8x128xf32>,
    %c0_i32_8 = arith.constant 0 : i32
    %9 = arith.cmpi eq, %arg1, %c0_i32_8 : i32
    %10 = arith.extui %9 : i1 to i32
    %c0_i32_9 = arith.constant 0 : i32
    %11 = arith.cmpi ne, %10, %c0_i32_9 : i32
    scf.if %11 {
      %c0_10 = arith.constant 0 : index
      %c0_11 = arith.constant 0 : index
      %12 = vector.load %arg8[%c0_10, %c0_11] : memref<8x128xf32, #tpu.memory_space<vmem>>, vector<8x128xf32>
      %c0_12 = arith.constant 0 : index
      %c0_13 = arith.constant 0 : index
      %13 = vector.load %arg4[%c0_12, %c0_13] : memref<1x128xf32, #tpu.memory_space<vmem>>, vector<1x128xf32>
      %14 = vector.broadcast %13 : vector<1x128xf32> to vector<8x128xf32>
      %15 = arith.addf %12, %14 : vector<8x128xf32>
      %cst_14 = arith.constant 0.000000e+00 : f32
      %16 = vector.broadcast %cst_14 : f32 to vector<8x128xf32>
      %17 = arith.maximumf %15, %16 : vector<8x128xf32>
      %c0_15 = arith.constant 0 : index
      %c0_16 = arith.constant 0 : index
      %18 = vector.load %arg5[%c0_15, %c0_16] : memref<128x128xf32, #tpu.memory_space<vmem>>, vector<128x128xf32>
      %cst_17 = arith.constant dense<0.000000e+00> : vector<8x128xf32>
      %19 = tpu.matmul %17, %18, %cst_17 {dimension_numbers = #tpu.dot_dimension_numbers<[1], [0], [0], [1], [0, 0, 1, 1], [], []>} : vector<8x128xf32>, vector<128x128xf32>, vector<8x128xf32> -> vector<8x128xf32>
      %c0_18 = arith.constant 0 : index
      %c0_19 = arith.constant 0 : index
      %20 = vector.load %arg6[%c0_18, %c0_19] : memref<1x128xf32, #tpu.memory_space<vmem>>, vector<1x128xf32>
      %21 = vector.broadcast %20 : vector<1x128xf32> to vector<8x128xf32>
      %22 = arith.addf %19, %21 : vector<8x128xf32>
      %cst_20 = arith.constant dense<0xFF800000> : vector<8xf32>
      %23 = vector.multi_reduction <maximumf>, %22, %cst_20 [1] : vector<8x128xf32> to vector<8xf32>
      %24 = vector.shape_cast %23 : vector<8xf32> to vector<8x1xf32>
      %25 = vector.broadcast %24 : vector<8x1xf32> to vector<8x128xf32>
      %26 = arith.subf %22, %25 : vector<8x128xf32>
      %27 = math.exp %26 : vector<8x128xf32>
      %cst_21 = arith.constant dense<0.000000e+00> : vector<8xf32>
      %28 = vector.multi_reduction <add>, %27, %cst_21 [1] : vector<8x128xf32> to vector<8xf32>
      %29 = vector.shape_cast %28 : vector<8xf32> to vector<8x1xf32>
      %30 = math.log %29 : vector<8x1xf32>
      %31 = vector.broadcast %30 : vector<8x1xf32> to vector<8x128xf32>
      %32 = arith.subf %26, %31 : vector<8x128xf32>
      %c0_22 = arith.constant 0 : index
      %c0_23 = arith.constant 0 : index
      %33 = vector.load %arg7[%c0_22, %c0_23] : memref<8x128xf32, #tpu.memory_space<vmem>>, vector<8x128xf32>
      tpu.vector_store %arg7[%c0_22, %c0_23], %32 {strides = array<i32>} : memref<8x128xf32, #tpu.memory_space<vmem>>, vector<8x128xf32>,
    } else {
    }
    return
  }
  func.func @transform_0(%arg0: i32, %arg1: i32) -> (i32, i32) {
    %c0_i32 = arith.constant 0 : i32
    return %arg0, %arg1 : i32, i32
  }
  func.func @transform_1(%arg0: i32, %arg1: i32) -> (i32, i32) {
    %c0_i32 = arith.constant 0 : i32
    %c0_i32_0 = arith.constant 0 : i32
    %c0_i32_1 = arith.constant 0 : i32
    return %c0_i32, %c0_i32_0 : i32, i32
  }
  func.func @transform_2(%arg0: i32, %arg1: i32) -> (i32, i32) {
    %c0_i32 = arith.constant 0 : i32
    %c0_i32_0 = arith.constant 0 : i32
    %c0_i32_1 = arith.constant 0 : i32
    return %c0_i32, %c0_i32_0 : i32, i32
  }
  func.func @transform_3(%arg0: i32, %arg1: i32) -> (i32, i32) {
    %c0_i32 = arith.constant 0 : i32
    %c0_i32_0 = arith.constant 0 : i32
    %c0_i32_1 = arith.constant 0 : i32
    return %c0_i32, %c0_i32_0 : i32, i32
  }
  func.func @transform_4(%arg0: i32, %arg1: i32) -> (i32, i32) {
    %c0_i32 = arith.constant 0 : i32
    %c0_i32_0 = arith.constant 0 : i32
    %c0_i32_1 = arith.constant 0 : i32
    return %c0_i32, %c0_i32_0 : i32, i32
  }
  func.func @transform_5(%arg0: i32, %arg1: i32) -> (i32, i32) {
    %c0_i32 = arith.constant 0 : i32
    %c0_i32_0 = arith.constant 0 : i32
    return %arg0, %c0_i32 : i32, i32
  }
}

</mosaic_0001>

<bundles_post_ra>
// kernel: mlp_classifier_forward.1
= control target key start
LH: loop header
LB: loop body
LE: loop exit
PB: predicated region body
PF: predicated region fallthrough
CT: control target
= control target key end

     0   :  { %v361_v2 = vmov 0.0|0.0   ;;  %vm362_vm0 = vmmov 0   ;;  %v363_v4 = vmov 0.0   ;;  %vm30_vm1 = vcmask 130048   ;;  %s470_s0 = inlined_call_operand.vmem [shape: f32[8,16], index: 0, kind: input, shape index: {}]   ;;  %s471_s1 = inlined_call_operand.vmem [shape: f32[16,128], index: 1, kind: input, shape index: {}]   ;;  %s472_s2 = inlined_call_operand.vmem [shape: f32[1,128], index: 2, kind: input, shape index: {}]   ;;  %s473_s3 = inlined_call_operand.vmem [shape: f32[128,128], index: 3, kind: input, shape index: {}]   ;;  %s474_s4 = inlined_call_operand.vmem [shape: f32[1,128], index: 4, kind: input, shape index: {}]   ;;  %s475_s5 = inlined_call_operand.hbm [shape: f32[8,128], index: 5, kind: output, shape index: {}]  }
   0x1   :  { %v28_v0 = vld [vmem:[%s471_s1] sm:$0xff]  ;;  %v29_v1 = vld [vmem:[%s471_s1 + $0x8] sm:$0xff]  ;;  %302 = vmatprep.subr.bf16.mxu0 %v361_v2  ;;  %264 = vmatprep.mubr.msk.f32.mxu0 %vm362_vm0, %v363_v4  ;;  %v121_v7 = vld [vmem:[%s473_s3 + $0x10] sm:$0xff] }
   0x2   :  { %v303_v3 = vpack.c.bf16 %v29_v1, %v28_v0  ;;  %v119_v5 = vld [vmem:[%s473_s3] sm:$0xff]  ;;  %v120_v6 = vld [vmem:[%s473_s3 + $0x8] sm:$0xff]  ;;  %305 = vmatprep.subr.bf16.mxu1 %v361_v2  ;;  %v122_v9 = vld [vmem:[%s473_s3 + $0x18] sm:$0xff]  ;;  %299 = vmatprep.mubr.msk.f32.mxu1 %vm362_vm0, %v363_v4 }
   0x3   :  { %v306_v8 = vpack.c.bf16 %v120_v6, %v119_v5  ;;  %v26_v10 = vld [vmem:[%s470_s0] sm:$0xff]  ;;  %v309_v11 = vpack.c.bf16 %v122_v9, %v121_v7  ;;  %v124_v13 = vld [vmem:[%s473_s3 + $0x28] sm:$0xff] }
   0x4   :  { %304 = vmatpush3.bf16.msra.mxu0 %v303_v3  ;;  %v123_v12 = vld [vmem:[%s473_s3 + $0x20] sm:$0xff] }
   0x5   :  { %307 = vmatpush3.bf16.msra.mxu1 %v306_v8 }
   0x6   :  { %308 = vmatprep.subr.bf16.mxu1 %v361_v2 }
   0x7   :  { %10 = vsyncpa [#allocation4], 0  ;;  %265 = vmatmul.mubr.msk.f32.vlgmr.msra.gmra.mrb[0].mxu0 %vm30_vm1, %v26_v10  ;;  %v312_v14 = vpack.c.bf16 %v124_v13, %v123_v12  ;;  %v125_v15 = vld [vmem:[%s473_s3 + $0x30] sm:$0xff]  ;;  %v126_v16 = vld [vmem:[%s473_s3 + $0x38] sm:$0xff] }
   0x8   :  { %v315_v17 = vpack.c.bf16 %v126_v16, %v125_v15  ;;  %v127_v18 = vld [vmem:[%s473_s3 + $0x40] sm:$0xff]  ;;  %v128_v19 = vld [vmem:[%s473_s3 + $0x48] sm:$0xff]  ;;  %v129_v21 = vld [vmem:[%s473_s3 + $0x50] sm:$0xff] }
   0x9   :  { %310 = vmatpush3.bf16.msra.mxu1 %v309_v11  ;;  %v318_v20 = vpack.c.bf16 %v128_v19, %v127_v18  ;;  %v130_v22 = vld [vmem:[%s473_s3 + $0x58] sm:$0xff]  ;;  %v131_v24 = vld [vmem:[%s473_s3 + $0x60] sm:$0xff]  ;;  %v132_v25 = vld [vmem:[%s473_s3 + $0x68] sm:$0xff] }
   0xa   :  { %311 = vmatprep.subr.bf16.mxu1 %v361_v2  ;;  %v321_v23 = vpack.c.bf16 %v130_v22, %v129_v21  ;;  %v324_v26 = vpack.c.bf16 %v132_v25, %v131_v24  ;;  %v133_v27 = vld [vmem:[%s473_s3 + $0x70] sm:$0xff]  ;;  %v134_v28 = vld [vmem:[%s473_s3 + $0x78] sm:$0xff]  ;;  %v238_v30 = vld [vmem:[%s472_s2] ss:$0 sm:$0xff]  ;;  %s364_s2 = smov [#allocation3]  }
   0xb   :  { %v327_v29 = vpack.c.bf16 %v134_v28, %v133_v27  ;;  %v239_v35 = vld [vmem:[%s474_s4] ss:$0 sm:$0xff]  ;;  %s229_s3 = sshll.u32 %s364_s2, 4  ;;  %s230_s3 = int_to_ptr.vmem [resolvable:$true] %s229_s3 }
   0xc   :  { %s337_s4 = scalar_lea.vmem %s230_s3, 128  ;;  %p342_p1 = scmp.lt.s32.totalorder %s230_s3, %s230_s3 }
   0xd   :  { %313 = vmatpush3.bf16.msra.mxu1 %v312_v14  ;;  %p338_p0 = scmp.ne.s32.totalorder %s230_s3, %s337_s4  ;;  %p343_p2 = scmp.lt.s32.totalorder %s337_s4, %s337_s4 }
   0xe   :  { %314 = vmatprep.subr.bf16.mxu1 %v361_v2 }
   0xf   :  { %p344_p3 = por %p343_p2, %p342_p1 }
  0x11   :  { %316 = vmatpush3.bf16.msra.mxu1 %v315_v17  ;;  %p345_p4 = pnand %p344_p3, %p338_p0 }
  0x12   :  { %317 = vmatprep.subr.bf16.mxu1 %v361_v2 }
  0x15   :  { %319 = vmatpush3.bf16.msra.mxu1 %v318_v20 }
  0x16   :  { %320 = vmatprep.subr.bf16.mxu1 %v361_v2 }
  0x19   :  { %322 = vmatpush3.bf16.msra.mxu1 %v321_v23 }
  0x1a   :  { %323 = vmatprep.subr.bf16.mxu1 %v361_v2 }
  0x1d   :  { %325 = vmatpush3.bf16.msra.mxu1 %v324_v26 }
  0x1e   :  { %326 = vmatprep.subr.bf16.mxu1 %v361_v2 }
  0x21   :  { %328 = vmatpush3.bf16.msra.mxu1 %v327_v29 }
  0xda   :  { %v100_v31 = vpop.f32.mrb[0].mxu0 }
  0xdb   :  { %v117_v32 = vadd.f32 %v238_v30, %v100_v31  ;;  %v266_v33 = vpop.f32.mrb[1].mxu0 }
  0xdd   :  { %v118_v34 = vmax.f32 %v117_v32, 0.0 }
  0xdf   :  { %300 = vmatmul.mubr.f32.vlgmr.msra.gmra.mrb[0].mxu1 %v118_v34 }
 0x1b2   :  { %v208_v36 = vpop.f32.mrb[0].mxu1 }
 0x1b3   :  { %v209_v37 = vadd.f32 %v239_v35, %v208_v36  ;;  %v301_v38 = vpop.f32.mrb[1].mxu1 }
 0x1b5   :  { %212 = vmax.xlane.f32.xlu0 %v209_v37 }
 0x242   :  { %v213_v39 = vpop.xlane.xlu0 %212 }
 0x243   :  { %v214_v40 = vsub.f32 %v209_v37, %v213_v39 }
 0x245   :  { %v215_v41 = vmul.f32 1.442695, %v214_v40 }
 0x247   :  { %333 = vpow2.f32 %v215_v41 }
 0x251   :  { %v334_v42 = vpop.eup %333 }
 0x252   :  { %217 = vadd.xlane.f32.xlu0 %v334_v42 }
 0x2df   :  { %v218_v43 = vpop.xlane.xlu0 %217 }
 0x2e0   :  { %335 = vlog2.f32 %v218_v43 }
 0x2ea   :  { %v336_v44 = vpop.eup %335 }
 0x2eb   :  { %v220_v45 = vmul.f32 0.6931472, %v336_v44 }
 0x2ed   :  { %v221_v46 = vsub.f32 %v214_v40, %v220_v45 }
 0x2ef   :  { %222 = vst [vmem:[#allocation3] sm:$0xff] %v221_v46 }
 0x2f0   :  { %348 = shalt.err (!%p345_p4)
}
 0x2f1   :  { %s349_s9 = scalar_lea.hbm %s475_s5, 128 }
 0x2f2   :  { %p350_p5 = scmp.ne.s32.totalorder %s475_s5, %s349_s9  ;;  %p353_p6 = scmp.lt.u32.totalorder %s349_s9, %s475_s5 }
 0x2f4   :  { %p355_p7 = pnand %p353_p6, %p350_p5 }
 0x2f6   :  { %358 = shalt.err (!%p355_p7)
}
 0x2f7   :  { %232 = dma.vmem_to_hbm [thread:$0]  %s230_s3, 128, %s475_s5, [#allocation4]  }
 0x2f8   :  { %359 = dma.done.wait [#allocation4], 128  }
 0x2f9   :  { %360 = vsyncadd [#allocation4], 4294967168 }
 0x2fa   :  { %236 = vsyncpa [#allocation4], 1 }

</bundles_post_ra>
